<compile_context>
chip_gen: v5e
topology: v5e:2x2
jax: 0.10.0
libtpu: 0.0.40
codegen_flags: <defaults>
</compile_context>

<pallas_src>
import math

import jax
import jax.numpy as jnp
from jax.experimental import pallas as pl
from jax.experimental.pallas import tpu as pltpu


_LANE = 1024      # lane-dense last dim (multiple of 128)
_ROW_TILE = 512   # 512 * 1024 * 4B = 2 MiB per f32 tile -> ~8 MiB double-buffered


def _scale_kernel(scale_ref, x_ref, o_ref):
    # scale_ref: (1,) float32 scalar in SMEM; x_ref/o_ref: (tm, _LANE) VMEM tiles.
    s = scale_ref[0]
    o_ref[...] = (x_ref[...] * s).astype(o_ref.dtype)


def scale_forward(x: jax.Array, scale) -> jax.Array:
    """Elementwise `scale * x` computed inside a Pallas TPU kernel."""
    orig_shape = x.shape
    orig_dtype = x.dtype
    total = math.prod(orig_shape) if orig_shape else 1

    if total == 0:
        # Nothing to do for empty tensors.
        return x

    # ---- Re-flatten to a lane-dense 2-D slab (rows, _LANE), padding if needed.
    flat = x.reshape(-1)
    padded_total = pl.cdiv(total, _LANE) * _LANE
    if padded_total != total:
        flat = jnp.pad(flat, (0, padded_total - total))
    rows = padded_total // _LANE
    x2d = flat.reshape(rows, _LANE)

    # Row tile: 512 rows (multiple of 8) when the slab is big enough, else the
    # full row extent (both satisfy the (8, 128) block constraint).  A partial
    # trailing block (rows % tm != 0) is masked by Pallas on writeback.
    tm = _ROW_TILE if rows >= _ROW_TILE else rows
    grid = (pl.cdiv(rows, tm),)

    # Keep the scale in float32 (like the PyTorch fp32 buffer); the cast back
    # to x.dtype happens on the product inside the kernel.
    scale_arr = jnp.asarray(scale, dtype=jnp.float32).reshape(1)

    out2d = pl.pallas_call(
        _scale_kernel,
        out_shape=jax.ShapeDtypeStruct((rows, _LANE), orig_dtype),
        grid=grid,
        in_specs=[
            pl.BlockSpec(memory_space=pltpu.MemorySpace.SMEM),   # scalar scale
            pl.BlockSpec((tm, _LANE), lambda i: (i, 0)),         # lane-dense tile
        ],
        out_specs=pl.BlockSpec((tm, _LANE), lambda i: (i, 0)),
        compiler_params=pltpu.CompilerParams(
            dimension_semantics=("parallel",),
        ),
    )(scale_arr, x2d)

    out_flat = out2d.reshape(-1)
    if padded_total != total:
        out_flat = out_flat[:total]
    return out_flat.reshape(orig_shape)


if __name__ == "__main__":
    key = jax.random.PRNGKey(0)

    # Small NCHW input, consistent with a conv-style feature map.
    x = jax.random.normal(key, (2, 4, 16, 16), dtype=jnp.float32)
    scale_value = 0.5  # deterministic "buffer" value for Scale(0.5)

    out = scale_forward(x, scale_value)
    out = jax.block_until_ready(out)

    ref = jnp.float32(scale_value) * x
    assert out.shape == x.shape and out.dtype == x.dtype
    assert jnp.allclose(out, ref, atol=0.0, rtol=0.0)

    # Extra check: a shape whose size is not a multiple of the lane width,
    # exercising the pad / un-pad path and the full-extent row tile.
    x2 = jax.random.normal(jax.random.PRNGKey(0), (3, 5, 7), dtype=jnp.float32)
    out2 = jax.block_until_ready(scale_forward(x2, 1.25))
    ref2 = jnp.float32(1.25) * x2
    assert out2.shape == x2.shape and out2.dtype == x2.dtype
    assert jnp.allclose(out2, ref2, atol=0.0, rtol=0.0)

    print("KERNEL_OK")
</pallas_src>

<mosaic_0001>
module attributes {stable_mosaic.version = 11 : i64} {
  func.func @_scale_kernel(%arg0: i32, %arg1: memref<1xf32, #tpu.memory_space<smem>>, %arg2: memref<2x1024xf32, #tpu.memory_space<vmem>>, %arg3: memref<2x1024xf32, #tpu.memory_space<vmem>>) attributes {dimension_semantics = [#tpu.dimension_semantics<parallel>], iteration_bounds = array<i64: 1>, scalar_prefetch = 0 : i64, scratch_operands = 0 : i64, tpu.core_type = #tpu.core_type<tc>, window_params = [{transform_indices = @transform_0, window_bounds = array<i64: 1>}, {transform_indices = @transform_1, window_bounds = array<i64: 2, 1024>}, {transform_indices = @transform_2, window_bounds = array<i64: 2, 1024>}]} {
    %c0 = arith.constant 0 : index
    %0 = memref.load %arg1[%c0] : memref<1xf32, #tpu.memory_space<smem>>
    %c0_0 = arith.constant 0 : index
    %c0_1 = arith.constant 0 : index
    %1 = vector.load %arg2[%c0_0, %c0_1] : memref<2x1024xf32, #tpu.memory_space<vmem>>, vector<2x1024xf32>
    %2 = vector.broadcast %0 : f32 to vector<2x1024xf32>
    %3 = arith.mulf %1, %2 : vector<2x1024xf32>
    %c0_2 = arith.constant 0 : index
    %c0_3 = arith.constant 0 : index
    %4 = vector.load %arg3[%c0_2, %c0_3] : memref<2x1024xf32, #tpu.memory_space<vmem>>, vector<2x1024xf32>
    tpu.vector_store %arg3[%c0_2, %c0_3], %3 {strides = array<i32>} : memref<2x1024xf32, #tpu.memory_space<vmem>>, vector<2x1024xf32>,
    return
  }
  func.func @transform_0(%arg0: i32) -> i32 {
    %c0_i32 = arith.constant 0 : i32
    %c0_i32_0 = arith.constant 0 : i32
    return %c0_i32 : i32
  }
  func.func @transform_1(%arg0: i32) -> (i32, i32) {
    %c0_i32 = arith.constant 0 : i32
    %c0_i32_0 = arith.constant 0 : i32
    return %arg0, %c0_i32 : i32, i32
  }
  func.func @transform_2(%arg0: i32) -> (i32, i32) {
    %c0_i32 = arith.constant 0 : i32
    %c0_i32_0 = arith.constant 0 : i32
    return %arg0, %c0_i32 : i32, i32
  }
}

</mosaic_0001>

<bundles_post_ra>
// kernel: tpu_custom_call.1
= control target key start
LH: loop header
LB: loop body
LE: loop exit
PB: predicated region body
PF: predicated region fallthrough
CT: control target
= control target key end

     0   :  { %8 = vsyncpa [#allocation4], 0  ;;  %s132_s0 = inlined_call_operand.<no memory space> [shape: f32[1], index: 0, kind: input, shape index: {}]   ;;  %s133_s1 = inlined_call_operand.hbm [shape: f32[2,1024], index: 1, kind: input, shape index: {}]   ;;  %s134_s2 = inlined_call_operand.hbm [shape: f32[2,1024], index: 2, kind: output, shape index: {}]  }
   0x1   :  { %9 = vsyncpa [#allocation5], 0  ;;  %s17_s11 = sshll.u32 %s133_s1, 4  ;;  %s106_s12 = smov [#allocation3]   ;;  %s18_s11 = int_to_ptr.hbm [resolvable:$true] %s17_s11 }
   0x2   :  { %s19_s13 = sshll.u32 %s106_s12, 4  ;;  %s20_s13 = int_to_ptr.vmem [resolvable:$true] %s19_s13 }
   0x3   :  { %22 = dma.hbm_to_vmem [thread:$0]  %s18_s11, 256, %s20_s13, [#allocation4]  }
   0x4   :  { %102 = dma.done.wait [#allocation4], 256  }
   0x5   :  { %103 = vsyncadd [#allocation4], 4294967040  ;;  %v30_v0 = vstv %s132_s0  ;;  %s107_s16 = smov [#allocation6]   ;;  %s42_s20 = sshll.u32 %s134_s2, 4  ;;  %v28_v1 = vld [vmem:[#allocation3] sm:$0xff]  ;;  %v29_v2 = vld [vmem:[#allocation3 + $0x8] sm:$0xff]  ;;  %s43_s20 = int_to_ptr.hbm [resolvable:$true] %s42_s20 }
   0x6   :  { %s40_s17 = sshll.u32 %s107_s16, 4  ;;  %v31_v3 = vmul.f32 %v30_v0, %v28_v1  ;;  %v32_v4 = vmul.f32 %v30_v0, %v29_v2  ;;  %s41_s17 = int_to_ptr.vmem [resolvable:$true] %s40_s17 }
   0x8   :  { %33 = vst [vmem:[#allocation6] sm:$0xff] %v31_v3 }
   0x9   :  { %34 = vst [vmem:[#allocation6 + $0x8] sm:$0xff] %v32_v4 }
   0xa   :  { %45 = dma.vmem_to_hbm [thread:$0]  %s41_s17, 256, %s43_s20, [#allocation5]  }
   0xb   :  { %104 = dma.done.wait [#allocation5], 256  }
   0xc   :  { %105 = vsyncadd [#allocation5], 4294967040 }
   0xd   :  { %50 = vsyncpa [#allocation4], 1 }
   0xe   :  { %51 = vsyncpa [#allocation5], 1 }

</bundles_post_ra>
